<compile_context>
chip_gen: v7x
topology: tpu7x:2x2x1
jax: 0.10.0
libtpu: 0.0.40
codegen_flags: <defaults>
</compile_context>

<pallas_src>
import functools

import jax
import jax.numpy as jnp
from jax import lax
from jax.experimental import pallas as pl
from jax.experimental.pallas import tpu as pltpu

NEG_SLOPE = 0.2      # PyG GATConv default negative_slope
NEG_INF = -1e30      # finite "minus inf": exp(NEG_INF - rowmax) == 0.0 exactly in f32


def _fused_gat_kernel(x_ref, w1_ref, as1_ref, ad1_ref, b1_ref,
                      w2_ref, as2_ref, ad2_ref, b2_ref, adj_ref,
                      out_ref,
                      hsrc1, ssrc1, h1act, hsrc2, ssrc2,
                      *, heads1, f1, tq):
    layer = pl.program_id(0)                 # 0: conv1 + ELU, 1: conv2 + log_softmax
    rblk = pl.program_id(1)                  # target-row tile
    row0 = pl.multiple_of(rblk * tq, tq)

    # int8 adjacency tile -> boolean mask (adj[t, s] != 0), shared by both phases.
    mask = adj_ref[...].astype(jnp.float32) > 0.0                       # (TQ, N)

    def fill_src_rows(ssrc, h_all, a_src, heads, fdim):
        # a_src.(W x_s) for all source nodes, laid out (heads, N) with the
        # source axis on lanes.  Runs once per layer (rblk == 0 only).
        for hd in range(heads):
            hh = h_all[:, hd * fdim:(hd + 1) * fdim]                    # (N, f)
            ssrc[hd:hd + 1, :] = lax.dot_general(
                a_src[hd:hd + 1, :], hh, (((1,), (1,)), ((), ())),
                preferred_element_type=jnp.float32)                     # (1, N)

    def dst_cols(h_t, a_dst, heads, fdim):
        # a_dst.(W x_t) for this row tile: pure VPU mul + lane reduce.
        return [jnp.sum(h_t[:, hd * fdim:(hd + 1) * fdim] * a_dst[hd:hd + 1, :],
                        axis=-1, keepdims=True) for hd in range(heads)]  # (TQ, 1)

    def attention(h_all, src_rows, d_cols, heads, fdim):
        outs = []
        for hd in range(heads):
            e = d_cols[hd] + src_rows[hd:hd + 1, :]                     # (TQ, N)
            e = jnp.where(e > 0, e, NEG_SLOPE * e)                      # LeakyReLU(0.2)
            e = jnp.where(mask, e, NEG_INF)
            e = e - jnp.max(e, axis=-1, keepdims=True)
            p = jnp.exp(e)                                              # masked -> exactly 0
            alpha = p * pl.reciprocal(jnp.sum(p, axis=-1, keepdims=True),
                                      approx=True)
            hh = h_all[:, hd * fdim:(hd + 1) * fdim]
            outs.append(jnp.dot(alpha.astype(jnp.bfloat16),
                                hh.astype(jnp.bfloat16),
                                preferred_element_type=jnp.float32))    # (TQ, f)
        return outs[0] if heads == 1 else jnp.concatenate(outs, axis=-1)

    # ---------------- phase 0: GATConv(in_c, f1, heads1) + ELU ----------------
    @pl.when(layer == 0)
    def _layer1():
        @pl.when(rblk == 0)
        def _init1():
            h = jnp.dot(x_ref[...].astype(jnp.bfloat16),
                        w1_ref[...].astype(jnp.bfloat16),
                        preferred_element_type=jnp.float32)             # (N, heads1*f1)
            hsrc1[...] = h
            fill_src_rows(ssrc1, h, as1_ref[...], heads1, f1)

        h_t = hsrc1[pl.ds(row0, tq), :]                                 # (TQ, heads1*f1)
        d_cols = dst_cols(h_t, ad1_ref[...], heads1, f1)
        out1 = attention(hsrc1[...], ssrc1[...], d_cols, heads1, f1) + b1_ref[...]
        out1 = jnp.where(out1 > 0, out1, jnp.exp(out1) - 1.0)           # ELU
        h1act[pl.ds(row0, tq), :] = out1

    # ---------- phase 1: GATConv(heads1*f1, C, 1) + log_softmax ---------------
    @pl.when(layer == 1)
    def _layer2():
        c = out_ref.shape[-1]

        @pl.when(rblk == 0)
        def _init2():
            g = jnp.dot(h1act[...].astype(jnp.bfloat16),
                        w2_ref[...].astype(jnp.bfloat16),
                        preferred_element_type=jnp.float32)             # (N, C)
            hsrc2[...] = g
            fill_src_rows(ssrc2, g, as2_ref[...], 1, c)

        g_t = hsrc2[pl.ds(row0, tq), :]
        d_cols = dst_cols(g_t, ad2_ref[...], 1, c)
        out2 = attention(hsrc2[...], ssrc2[...], d_cols, 1, c) + b2_ref[...]
        # exact f32 log_softmax over classes
        m = jnp.max(out2, axis=-1, keepdims=True)
        lse = m + jnp.log(jnp.sum(jnp.exp(out2 - m), axis=-1, keepdims=True))
        out_ref[...] = (out2 - lse).astype(out_ref.dtype)


def custom_gat_forward(x, adj, params, *, tile_rows=256):
    """Eval-mode forward of CustomGAT as a single fused Pallas call.

    x:   [N, F_in] float32 node features.
    adj: [N, N] adjacency mask, adj[t, s] != 0 iff edge s->t (self loops added).
    tile_rows: target-row tile size.  Per-step working set is roughly
      2*TQ*N bytes (int8 adj, double buffered) + 4*TQ*N (f32 logits)
      + 4*N*(heads*f1) (resident features).  256 keeps this well under v7x's
      64 MiB VMEM for mid-sized graphs; on v6e/v5e (128 MiB) sweep 512-2048
      to amortize the ~0.35 us/step overhead.
    """
    n, f_in = x.shape
    w1, as1, ad1, b1 = params["w1"], params["asrc1"], params["adst1"], params["b1"]
    w2, as2, ad2, b2 = params["w2"], params["asrc2"], params["adst2"], params["b2"]
    heads1, f1 = as1.shape
    hid = heads1 * f1
    c = w2.shape[1]

    # Row tiling (multiple of 8 sublanes); pad node count up to a tile multiple.
    n_up8 = -(-n // 8) * 8
    tq = max(8, (int(min(tile_rows, n_up8)) // 8) * 8)
    n_pad = -(-n // tq) * tq
    r_tiles = n_pad // tq

    # Padded rows have no edges; with finite NEG_INF masking they stay finite
    # and are masked out as sources, then sliced off at the end.
    x_p = jnp.zeros((n_pad, f_in), jnp.float32).at[:n, :].set(x.astype(jnp.float32))
    adj_p = jnp.zeros((n_pad, n_pad), jnp.int8).at[:n, :n].set(
        (adj != 0).astype(jnp.int8))

    kernel = functools.partial(_fused_gat_kernel, heads1=heads1, f1=f1, tq=tq)
    full = lambda a: pl.BlockSpec(a.shape, lambda l, r: (0,) * a.ndim)

    flops = (2 * n_pad * f_in * hid + 2 * heads1 * n_pad * n_pad * f1
             + 2 * n_pad * hid * c + 2 * n_pad * n_pad * c)
    transcendentals = (heads1 + 1) * n_pad * n_pad + n_pad * (hid + 2 * c)
    bytes_accessed = (2 * n_pad * n_pad                       # int8 adj, once per phase
                      + 4 * n_pad * (f_in + c)
                      + 4 * (w1.size + w2.size + as1.size + ad1.size + b1.size
                             + as2.size + ad2.size + b2.size))

    out = pl.pallas_call(
        kernel,
        out_shape=jax.ShapeDtypeStruct((n_pad, c), jnp.float32),
        grid_spec=pltpu.PrefetchScalarGridSpec(
            num_scalar_prefetch=0,
            grid=(2, r_tiles),                                # (layer phase, row tile)
            in_specs=[full(x_p), full(w1), full(as1), full(ad1), full(b1),
                      full(w2), full(as2), full(ad2), full(b2),
                      pl.BlockSpec((tq, n_pad), lambda l, r: (r, 0))],
            # Output rows are produced only in the layer-1 phase; (l*r) keeps the
            # output block index monotone so no stale buffer is written back.
            out_specs=pl.BlockSpec((tq, c), lambda l, r: (l * r, 0)),
            scratch_shapes=[
                pltpu.VMEM((n_pad, hid), jnp.float32),        # W1 x   (all nodes)
                pltpu.VMEM((heads1, n_pad), jnp.float32),     # a_src1.(W1 x)
                pltpu.VMEM((n_pad, hid), jnp.float32),        # ELU(conv1 out)
                pltpu.VMEM((n_pad, c), jnp.float32),          # W2 h   (all nodes)
                pltpu.VMEM((1, n_pad), jnp.float32),          # a_src2.(W2 h)
            ]),
        compiler_params=pltpu.CompilerParams(
            # Layer-2 tiles read layer-1's VMEM scratch -> sequential grid.
            dimension_semantics=("arbitrary", "arbitrary"),
            vmem_limit_bytes=32 * 1024 * 1024),
        cost_estimate=pl.CostEstimate(flops=int(flops),
                                      transcendentals=int(transcendentals),
                                      bytes_accessed=int(bytes_accessed)),
    )(x_p, w1, as1, ad1, b1, w2, as2, ad2, b2, adj_p)
    return out[:n]


def build_dense_adj(edge_index, num_nodes):
    """edge_index: [2, E] (row 0 = source, row 1 = target). adj[t, s] = 1 (+ self loops)."""
    src, dst = edge_index
    adj = jnp.zeros((num_nodes, num_nodes), jnp.float32)
    adj = adj.at[dst, src].set(1.0)
    adj = adj.at[jnp.arange(num_nodes), jnp.arange(num_nodes)].set(1.0)
    return adj


if __name__ == "__main__":
    key = jax.random.PRNGKey(0)
    N, IN_C, HID, HEADS, OUT_C = 16, 16, 8, 4, 4

    k_x, k1, k2, k3, k4, k5, k6 = jax.random.split(key, 7)
    x = jax.random.normal(k_x, (N, IN_C), jnp.float32)
    # ring graph, both directions
    src = jnp.concatenate([jnp.arange(N), jnp.arange(N)])
    dst = jnp.concatenate([(jnp.arange(N) + 1) % N, (jnp.arange(N) - 1) % N])
    edge_index = jnp.stack([src, dst])
    adj = build_dense_adj(edge_index, N)

    # Shapes follow GATConv(IN_C, 8, heads=4) and GATConv(32, OUT_C, heads=1).
    params = {
        "w1":    0.1 * jax.random.normal(k1, (IN_C, HEADS * HID), jnp.float32),
        "asrc1": 0.1 * jax.random.normal(k2, (HEADS, HID), jnp.float32),
        "adst1": 0.1 * jax.random.normal(k3, (HEADS, HID), jnp.float32),
        "b1":    jnp.zeros((1, HEADS * HID), jnp.float32),
        "w2":    0.1 * jax.random.normal(k4, (HEADS * HID, OUT_C), jnp.float32),
        "asrc2": 0.1 * jax.random.normal(k5, (1, OUT_C), jnp.float32),
        "adst2": 0.1 * jax.random.normal(k6, (1, OUT_C), jnp.float32),
        "b2":    jnp.zeros((1, OUT_C), jnp.float32),
    }

    # tile_rows=8 -> grid (2 phases, 2 row tiles): exercises tiling + fusion.
    out = jax.block_until_ready(custom_gat_forward(x, adj, params, tile_rows=8))
    assert out.shape == (N, OUT_C)
    assert bool(jnp.all(jnp.isfinite(out)))
    # log_softmax rows must sum to ~1 in probability space
    assert bool(jnp.allclose(jnp.sum(jnp.exp(out), axis=-1), 1.0, atol=1e-3))
    print("KERNEL_OK")
</pallas_src>

<mosaic_0001>
module attributes {stable_mosaic.version = 11 : i64} {
  func.func @_fused_gat_kernel(%arg0: i32, %arg1: i32, %arg2: memref<16x16xf32, #tpu.memory_space<vmem>>, %arg3: memref<16x32xf32, #tpu.memory_space<vmem>>, %arg4: memref<4x8xf32, #tpu.memory_space<vmem>>, %arg5: memref<4x8xf32, #tpu.memory_space<vmem>>, %arg6: memref<1x32xf32, #tpu.memory_space<vmem>>, %arg7: memref<32x4xf32, #tpu.memory_space<vmem>>, %arg8: memref<1x4xf32, #tpu.memory_space<vmem>>, %arg9: memref<1x4xf32, #tpu.memory_space<vmem>>, %arg10: memref<1x4xf32, #tpu.memory_space<vmem>>, %arg11: memref<8x16xi8, #tpu.memory_space<vmem>>, %arg12: memref<8x4xf32, #tpu.memory_space<vmem>>, %arg13: memref<16x32xf32, #tpu.memory_space<vmem>>, %arg14: memref<4x16xf32, #tpu.memory_space<vmem>>, %arg15: memref<16x32xf32, #tpu.memory_space<vmem>>, %arg16: memref<16x4xf32, #tpu.memory_space<vmem>>, %arg17: memref<1x16xf32, #tpu.memory_space<vmem>>) attributes {dimension_semantics = [#tpu.dimension_semantics<arbitrary>, #tpu.dimension_semantics<arbitrary>], iteration_bounds = array<i64: 2, 2>, scalar_prefetch = 0 : i64, scratch_operands = 5 : i64, tpu.core_type = #tpu.core_type<tc>, window_params = [{pipeline_mode = #tpu.pipeline_mode<synchronous>, transform_indices = @transform_0, window_bounds = array<i64: 16, 16>}, {pipeline_mode = #tpu.pipeline_mode<synchronous>, transform_indices = @transform_1, window_bounds = array<i64: 16, 32>}, {pipeline_mode = #tpu.pipeline_mode<synchronous>, transform_indices = @transform_2, window_bounds = array<i64: 4, 8>}, {pipeline_mode = #tpu.pipeline_mode<synchronous>, transform_indices = @transform_3, window_bounds = array<i64: 4, 8>}, {pipeline_mode = #tpu.pipeline_mode<synchronous>, transform_indices = @transform_4, window_bounds = array<i64: 1, 32>}, {pipeline_mode = #tpu.pipeline_mode<synchronous>, transform_indices = @transform_5, window_bounds = array<i64: 32, 4>}, {pipeline_mode = #tpu.pipeline_mode<synchronous>, transform_indices = @transform_6, window_bounds = array<i64: 1, 4>}, {pipeline_mode = #tpu.pipeline_mode<synchronous>, transform_indices = @transform_7, window_bounds = array<i64: 1, 4>}, {pipeline_mode = #tpu.pipeline_mode<synchronous>, transform_indices = @transform_8, window_bounds = array<i64: 1, 4>}, {transform_indices = @transform_9, window_bounds = array<i64: 8, 16>}, {transform_indices = @transform_10, window_bounds = array<i64: 8, 4>}]} {
    %c8_i32 = arith.constant 8 : i32
    %0 = arith.muli %arg1, %c8_i32 : i32
    %1 = tpu.assume_multiple %0, 8 : i32
    %c0 = arith.constant 0 : index
    %c0_0 = arith.constant 0 : index
    %2 = vector.load %arg11[%c0, %c0_0] : memref<8x16xi8, #tpu.memory_space<vmem>>, vector<8x16xi8>
    %3 = arith.sitofp %2 : vector<8x16xi8> to vector<8x16xf32>
    %cst = arith.constant 0.000000e+00 : f32
    %4 = vector.broadcast %cst : f32 to vector<8x16xf32>
    %5 = arith.cmpf ogt, %3, %4 : vector<8x16xf32>
    %c0_i32 = arith.constant 0 : i32
    %6 = arith.cmpi eq, %arg0, %c0_i32 : i32
    %7 = arith.extui %6 : i1 to i32
    %c0_i32_1 = arith.constant 0 : i32
    %8 = arith.cmpi ne, %7, %c0_i32_1 : i32
    scf.if %8 {
      %c0_i32_3 = arith.constant 0 : i32
      %12 = arith.cmpi eq, %arg1, %c0_i32_3 : i32
      %13 = arith.extui %12 : i1 to i32
      %c0_i32_4 = arith.constant 0 : i32
      %14 = arith.cmpi ne, %13, %c0_i32_4 : i32
      scf.if %14 {
        %c0_45 = arith.constant 0 : index
        %c0_46 = arith.constant 0 : index
        %156 = vector.load %arg2[%c0_45, %c0_46] : memref<16x16xf32, #tpu.memory_space<vmem>>, vector<16x16xf32>
        %157 = arith.truncf %156 : vector<16x16xf32> to vector<16x16xbf16>
        %c0_47 = arith.constant 0 : index
        %c0_48 = arith.constant 0 : index
        %158 = vector.load %arg3[%c0_47, %c0_48] : memref<16x32xf32, #tpu.memory_space<vmem>>, vector<16x32xf32>
        %159 = arith.truncf %158 : vector<16x32xf32> to vector<16x32xbf16>
        %cst_49 = arith.constant dense<0.000000e+00> : vector<16x32xf32>
        %160 = tpu.matmul %157, %159, %cst_49 {dimension_numbers = #tpu.dot_dimension_numbers<[1], [0], [0], [1], [0, 0, 1, 1], [], []>} : vector<16x16xbf16>, vector<16x32xbf16>, vector<16x32xf32> -> vector<16x32xf32>
        %c0_50 = arith.constant 0 : index
        %c0_51 = arith.constant 0 : index
        %161 = vector.load %arg13[%c0_50, %c0_51] : memref<16x32xf32, #tpu.memory_space<vmem>>, vector<16x32xf32>
        tpu.vector_store %arg13[%c0_50, %c0_51], %160 {strides = array<i32>} : memref<16x32xf32, #tpu.memory_space<vmem>>, vector<16x32xf32>,
        %c0_52 = arith.constant 0 : index
        %c0_53 = arith.constant 0 : index
        %162 = vector.load %arg4[%c0_52, %c0_53] : memref<4x8xf32, #tpu.memory_space<vmem>>, vector<4x8xf32>
        %163 = vector.extract_strided_slice %160 {offsets = [0, 0], sizes = [16, 8], strides = [1, 1]} : vector<16x32xf32> to vector<16x8xf32>
        %164 = vector.extract_strided_slice %162 {offsets = [0, 0], sizes = [1, 8], strides = [1, 1]} : vector<4x8xf32> to vector<1x8xf32>
        %cst_54 = arith.constant dense<0.000000e+00> : vector<1x16xf32>
        %165 = tpu.matmul %164, %163, %cst_54 {dimension_numbers = #tpu.dot_dimension_numbers<[1], [1], [0], [0], [0, 0, 1, 0], [], []>} : vector<1x8xf32>, vector<16x8xf32>, vector<1x16xf32> -> vector<1x16xf32>
        %c0_55 = arith.constant 0 : index
        %c0_56 = arith.constant 0 : index
        %166 = vector.load %arg14[%c0_55, %c0_56] : memref<4x16xf32, #tpu.memory_space<vmem>>, vector<1x16xf32>
        tpu.vector_store %arg14[%c0_55, %c0_56], %165 {strides = array<i32>} : memref<4x16xf32, #tpu.memory_space<vmem>>, vector<1x16xf32>,
        %167 = vector.extract_strided_slice %160 {offsets = [0, 8], sizes = [16, 8], strides = [1, 1]} : vector<16x32xf32> to vector<16x8xf32>
        %168 = vector.extract_strided_slice %162 {offsets = [1, 0], sizes = [1, 8], strides = [1, 1]} : vector<4x8xf32> to vector<1x8xf32>
        %cst_57 = arith.constant dense<0.000000e+00> : vector<1x16xf32>
        %169 = tpu.matmul %168, %167, %cst_57 {dimension_numbers = #tpu.dot_dimension_numbers<[1], [1], [0], [0], [0, 0, 1, 0], [], []>} : vector<1x8xf32>, vector<16x8xf32>, vector<1x16xf32> -> vector<1x16xf32>
        %c1 = arith.constant 1 : index
        %c0_58 = arith.constant 0 : index
        %170 = vector.load %arg14[%c1, %c0_58] : memref<4x16xf32, #tpu.memory_space<vmem>>, vector<1x16xf32>
        tpu.vector_store %arg14[%c1, %c0_58], %169 {strides = array<i32>} : memref<4x16xf32, #tpu.memory_space<vmem>>, vector<1x16xf32>,
        %171 = vector.extract_strided_slice %160 {offsets = [0, 16], sizes = [16, 8], strides = [1, 1]} : vector<16x32xf32> to vector<16x8xf32>
        %172 = vector.extract_strided_slice %162 {offsets = [2, 0], sizes = [1, 8], strides = [1, 1]} : vector<4x8xf32> to vector<1x8xf32>
        %cst_59 = arith.constant dense<0.000000e+00> : vector<1x16xf32>
        %173 = tpu.matmul %172, %171, %cst_59 {dimension_numbers = #tpu.dot_dimension_numbers<[1], [1], [0], [0], [0, 0, 1, 0], [], []>} : vector<1x8xf32>, vector<16x8xf32>, vector<1x16xf32> -> vector<1x16xf32>
        %c2 = arith.constant 2 : index
        %c0_60 = arith.constant 0 : index
        %174 = vector.load %arg14[%c2, %c0_60] : memref<4x16xf32, #tpu.memory_space<vmem>>, vector<1x16xf32>
        tpu.vector_store %arg14[%c2, %c0_60], %173 {strides = array<i32>} : memref<4x16xf32, #tpu.memory_space<vmem>>, vector<1x16xf32>,
        %175 = vector.extract_strided_slice %160 {offsets = [0, 24], sizes = [16, 8], strides = [1, 1]} : vector<16x32xf32> to vector<16x8xf32>
        %176 = vector.extract_strided_slice %162 {offsets = [3, 0], sizes = [1, 8], strides = [1, 1]} : vector<4x8xf32> to vector<1x8xf32>
        %cst_61 = arith.constant dense<0.000000e+00> : vector<1x16xf32>
        %177 = tpu.matmul %176, %175, %cst_61 {dimension_numbers = #tpu.dot_dimension_numbers<[1], [1], [0], [0], [0, 0, 1, 0], [], []>} : vector<1x8xf32>, vector<16x8xf32>, vector<1x16xf32> -> vector<1x16xf32>
        %c3 = arith.constant 3 : index
        %c0_62 = arith.constant 0 : index
        %178 = vector.load %arg14[%c3, %c0_62] : memref<4x16xf32, #tpu.memory_space<vmem>>, vector<1x16xf32>
        tpu.vector_store %arg14[%c3, %c0_62], %177 {strides = array<i32>} : memref<4x16xf32, #tpu.memory_space<vmem>>, vector<1x16xf32>,
      } else {
      }
      %15 = arith.index_cast %1 : i32 to index
      %c0_5 = arith.constant 0 : index
      %16 = vector.load %arg13[%15, %c0_5] : memref<16x32xf32, #tpu.memory_space<vmem>>, vector<8x32xf32>
      %c0_6 = arith.constant 0 : index
      %c0_7 = arith.constant 0 : index
      %17 = vector.load %arg5[%c0_6, %c0_7] : memref<4x8xf32, #tpu.memory_space<vmem>>, vector<4x8xf32>
      %18 = vector.extract_strided_slice %16 {offsets = [0, 0], sizes = [8, 8], strides = [1, 1]} : vector<8x32xf32> to vector<8x8xf32>
      %19 = vector.extract_strided_slice %17 {offsets = [0, 0], sizes = [1, 8], strides = [1, 1]} : vector<4x8xf32> to vector<1x8xf32>
      %20 = vector.broadcast %19 : vector<1x8xf32> to vector<8x8xf32>
      %21 = arith.mulf %18, %20 : vector<8x8xf32>
      %cst_8 = arith.constant dense<0.000000e+00> : vector<8xf32>
      %22 = vector.multi_reduction <add>, %21, %cst_8 [1] : vector<8x8xf32> to vector<8xf32>
      %23 = vector.shape_cast %22 : vector<8xf32> to vector<8x1xf32>
      %24 = vector.extract_strided_slice %16 {offsets = [0, 8], sizes = [8, 8], strides = [1, 1]} : vector<8x32xf32> to vector<8x8xf32>
      %25 = vector.extract_strided_slice %17 {offsets = [1, 0], sizes = [1, 8], strides = [1, 1]} : vector<4x8xf32> to vector<1x8xf32>
      %26 = vector.broadcast %25 : vector<1x8xf32> to vector<8x8xf32>
      %27 = arith.mulf %24, %26 : vector<8x8xf32>
      %cst_9 = arith.constant dense<0.000000e+00> : vector<8xf32>
      %28 = vector.multi_reduction <add>, %27, %cst_9 [1] : vector<8x8xf32> to vector<8xf32>
      %29 = vector.shape_cast %28 : vector<8xf32> to vector<8x1xf32>
      %30 = vector.extract_strided_slice %16 {offsets = [0, 16], sizes = [8, 8], strides = [1, 1]} : vector<8x32xf32> to vector<8x8xf32>
      %31 = vector.extract_strided_slice %17 {offsets = [2, 0], sizes = [1, 8], strides = [1, 1]} : vector<4x8xf32> to vector<1x8xf32>
      %32 = vector.broadcast %31 : vector<1x8xf32> to vector<8x8xf32>
      %33 = arith.mulf %30, %32 : vector<8x8xf32>
      %cst_10 = arith.constant dense<0.000000e+00> : vector<8xf32>
      %34 = vector.multi_reduction <add>, %33, %cst_10 [1] : vector<8x8xf32> to vector<8xf32>
      %35 = vector.shape_cast %34 : vector<8xf32> to vector<8x1xf32>
      %36 = vector.extract_strided_slice %16 {offsets = [0, 24], sizes = [8, 8], strides = [1, 1]} : vector<8x32xf32> to vector<8x8xf32>
      %37 = vector.extract_strided_slice %17 {offsets = [3, 0], sizes = [1, 8], strides = [1, 1]} : vector<4x8xf32> to vector<1x8xf32>
      %38 = vector.broadcast %37 : vector<1x8xf32> to vector<8x8xf32>
      %39 = arith.mulf %36, %38 : vector<8x8xf32>
      %cst_11 = arith.constant dense<0.000000e+00> : vector<8xf32>
      %40 = vector.multi_reduction <add>, %39, %cst_11 [1] : vector<8x8xf32> to vector<8xf32>
      %41 = vector.shape_cast %40 : vector<8xf32> to vector<8x1xf32>
      %c0_12 = arith.constant 0 : index
      %c0_13 = arith.constant 0 : index
      %42 = vector.load %arg13[%c0_12, %c0_13] : memref<16x32xf32, #tpu.memory_space<vmem>>, vector<16x32xf32>
      %c0_14 = arith.constant 0 : index
      %c0_15 = arith.constant 0 : index
      %43 = vector.load %arg14[%c0_14, %c0_15] : memref<4x16xf32, #tpu.memory_space<vmem>>, vector<4x16xf32>
      %44 = vector.extract_strided_slice %43 {offsets = [0, 0], sizes = [1, 16], strides = [1, 1]} : vector<4x16xf32> to vector<1x16xf32>
      %45 = vector.broadcast %23 : vector<8x1xf32> to vector<8x16xf32>
      %46 = vector.broadcast %44 : vector<1x16xf32> to vector<8x16xf32>
      %47 = arith.addf %45, %46 : vector<8x16xf32>
      %cst_16 = arith.constant 0.000000e+00 : f32
      %48 = vector.broadcast %cst_16 : f32 to vector<8x16xf32>
      %49 = arith.cmpf ogt, %47, %48 : vector<8x16xf32>
      %cst_17 = arith.constant 2.000000e-01 : f32
      %50 = vector.broadcast %cst_17 : f32 to vector<8x16xf32>
      %51 = arith.mulf %50, %47 : vector<8x16xf32>
      %52 = arith.select %49, %47, %51 : vector<8x16xi1>, vector<8x16xf32>
      %cst_18 = arith.constant -1.000000e+30 : f32
      %53 = vector.broadcast %cst_18 : f32 to vector<8x16xf32>
      %54 = arith.select %5, %52, %53 : vector<8x16xi1>, vector<8x16xf32>
      %cst_19 = arith.constant dense<0xFF800000> : vector<8xf32>
      %55 = vector.multi_reduction <maximumf>, %54, %cst_19 [1] : vector<8x16xf32> to vector<8xf32>
      %56 = vector.shape_cast %55 : vector<8xf32> to vector<8x1xf32>
      %57 = vector.broadcast %56 : vector<8x1xf32> to vector<8x16xf32>
      %58 = arith.subf %54, %57 : vector<8x16xf32>
      %59 = math.exp %58 : vector<8x16xf32>
      %cst_20 = arith.constant dense<0.000000e+00> : vector<8xf32>
      %60 = vector.multi_reduction <add>, %59, %cst_20 [1] : vector<8x16xf32> to vector<8xf32>
      %61 = vector.shape_cast %60 : vector<8xf32> to vector<8x1xf32>
      %62 = tpu.reciprocal %61 {approx = true} : vector<8x1xf32> -> vector<8x1xf32>
      %63 = vector.broadcast %62 : vector<8x1xf32> to vector<8x16xf32>
      %64 = arith.mulf %59, %63 : vector<8x16xf32>
      %65 = vector.extract_strided_slice %42 {offsets = [0, 0], sizes = [16, 8], strides = [1, 1]} : vector<16x32xf32> to vector<16x8xf32>
      %66 = arith.truncf %64 : vector<8x16xf32> to vector<8x16xbf16>
      %67 = arith.truncf %65 : vector<16x8xf32> to vector<16x8xbf16>
      %cst_21 = arith.constant dense<0.000000e+00> : vector<8x8xf32>
      %68 = tpu.matmul %66, %67, %cst_21 {dimension_numbers = #tpu.dot_dimension_numbers<[1], [0], [0], [1], [0, 0, 1, 1], [], []>} : vector<8x16xbf16>, vector<16x8xbf16>, vector<8x8xf32> -> vector<8x8xf32>
      %69 = vector.extract_strided_slice %43 {offsets = [1, 0], sizes = [1, 16], strides = [1, 1]} : vector<4x16xf32> to vector<1x16xf32>
      %70 = vector.broadcast %29 : vector<8x1xf32> to vector<8x16xf32>
      %71 = vector.broadcast %69 : vector<1x16xf32> to vector<8x16xf32>
      %72 = arith.addf %70, %71 : vector<8x16xf32>
      %cst_22 = arith.constant 0.000000e+00 : f32
      %73 = vector.broadcast %cst_22 : f32 to vector<8x16xf32>
      %74 = arith.cmpf ogt, %72, %73 : vector<8x16xf32>
      %cst_23 = arith.constant 2.000000e-01 : f32
      %75 = vector.broadcast %cst_23 : f32 to vector<8x16xf32>
      %76 = arith.mulf %75, %72 : vector<8x16xf32>
      %77 = arith.select %74, %72, %76 : vector<8x16xi1>, vector<8x16xf32>
      %cst_24 = arith.constant -1.000000e+30 : f32
      %78 = vector.broadcast %cst_24 : f32 to vector<8x16xf32>
      %79 = arith.select %5, %77, %78 : vector<8x16xi1>, vector<8x16xf32>
      %cst_25 = arith.constant dense<0xFF800000> : vector<8xf32>
      %80 = vector.multi_reduction <maximumf>, %79, %cst_25 [1] : vector<8x16xf32> to vector<8xf32>
      %81 = vector.shape_cast %80 : vector<8xf32> to vector<8x1xf32>
      %82 = vector.broadcast %81 : vector<8x1xf32> to vector<8x16xf32>
      %83 = arith.subf %79, %82 : vector<8x16xf32>
      %84 = math.exp %83 : vector<8x16xf32>
      %cst_26 = arith.constant dense<0.000000e+00> : vector<8xf32>
      %85 = vector.multi_reduction <add>, %84, %cst_26 [1] : vector<8x16xf32> to vector<8xf32>
      %86 = vector.shape_cast %85 : vector<8xf32> to vector<8x1xf32>
      %87 = tpu.reciprocal %86 {approx = true} : vector<8x1xf32> -> vector<8x1xf32>
      %88 = vector.broadcast %87 : vector<8x1xf32> to vector<8x16xf32>
      %89 = arith.mulf %84, %88 : vector<8x16xf32>
      %90 = vector.extract_strided_slice %42 {offsets = [0, 8], sizes = [16, 8], strides = [1, 1]} : vector<16x32xf32> to vector<16x8xf32>
      %91 = arith.truncf %89 : vector<8x16xf32> to vector<8x16xbf16>
      %92 = arith.truncf %90 : vector<16x8xf32> to vector<16x8xbf16>
      %cst_27 = arith.constant dense<0.000000e+00> : vector<8x8xf32>
      %93 = tpu.matmul %91, %92, %cst_27 {dimension_numbers = #tpu.dot_dimension_numbers<[1], [0], [0], [1], [0, 0, 1, 1], [], []>} : vector<8x16xbf16>, vector<16x8xbf16>, vector<8x8xf32> -> vector<8x8xf32>
      %94 = vector.extract_strided_slice %43 {offsets = [2, 0], sizes = [1, 16], strides = [1, 1]} : vector<4x16xf32> to vector<1x16xf32>
      %95 = vector.broadcast %35 : vector<8x1xf32> to vector<8x16xf32>
      %96 = vector.broadcast %94 : vector<1x16xf32> to vector<8x16xf32>
      %97 = arith.addf %95, %96 : vector<8x16xf32>
      %cst_28 = arith.constant 0.000000e+00 : f32
      %98 = vector.broadcast %cst_28 : f32 to vector<8x16xf32>
      %99 = arith.cmpf ogt, %97, %98 : vector<8x16xf32>
      %cst_29 = arith.constant 2.000000e-01 : f32
      %100 = vector.broadcast %cst_29 : f32 to vector<8x16xf32>
      %101 = arith.mulf %100, %97 : vector<8x16xf32>
      %102 = arith.select %99, %97, %101 : vector<8x16xi1>, vector<8x16xf32>
      %cst_30 = arith.constant -1.000000e+30 : f32
      %103 = vector.broadcast %cst_30 : f32 to vector<8x16xf32>
      %104 = arith.select %5, %102, %103 : vector<8x16xi1>, vector<8x16xf32>
      %cst_31 = arith.constant dense<0xFF800000> : vector<8xf32>
      %105 = vector.multi_reduction <maximumf>, %104, %cst_31 [1] : vector<8x16xf32> to vector<8xf32>
      %106 = vector.shape_cast %105 : vector<8xf32> to vector<8x1xf32>
      %107 = vector.broadcast %106 : vector<8x1xf32> to vector<8x16xf32>
      %108 = arith.subf %104, %107 : vector<8x16xf32>
      %109 = math.exp %108 : vector<8x16xf32>
      %cst_32 = arith.constant dense<0.000000e+00> : vector<8xf32>
      %110 = vector.multi_reduction <add>, %109, %cst_32 [1] : vector<8x16xf32> to vector<8xf32>
      %111 = vector.shape_cast %110 : vector<8xf32> to vector<8x1xf32>
      %112 = tpu.reciprocal %111 {approx = true} : vector<8x1xf32> -> vector<8x1xf32>
      %113 = vector.broadcast %112 : vector<8x1xf32> to vector<8x16xf32>
      %114 = arith.mulf %109, %113 : vector<8x16xf32>
      %115 = vector.extract_strided_slice %42 {offsets = [0, 16], sizes = [16, 8], strides = [1, 1]} : vector<16x32xf32> to vector<16x8xf32>
      %116 = arith.truncf %114 : vector<8x16xf32> to vector<8x16xbf16>
      %117 = arith.truncf %115 : vector<16x8xf32> to vector<16x8xbf16>
      %cst_33 = arith.constant dense<0.000000e+00> : vector<8x8xf32>
      %118 = tpu.matmul %116, %117, %cst_33 {dimension_numbers = #tpu.dot_dimension_numbers<[1], [0], [0], [1], [0, 0, 1, 1], [], []>} : vector<8x16xbf16>, vector<16x8xbf16>, vector<8x8xf32> -> vector<8x8xf32>
      %119 = vector.extract_strided_slice %43 {offsets = [3, 0], sizes = [1, 16], strides = [1, 1]} : vector<4x16xf32> to vector<1x16xf32>
      %120 = vector.broadcast %41 : vector<8x1xf32> to vector<8x16xf32>
      %121 = vector.broadcast %119 : vector<1x16xf32> to vector<8x16xf32>
      %122 = arith.addf %120, %121 : vector<8x16xf32>
      %cst_34 = arith.constant 0.000000e+00 : f32
      %123 = vector.broadcast %cst_34 : f32 to vector<8x16xf32>
      %124 = arith.cmpf ogt, %122, %123 : vector<8x16xf32>
      %cst_35 = arith.constant 2.000000e-01 : f32
      %125 = vector.broadcast %cst_35 : f32 to vector<8x16xf32>
      %126 = arith.mulf %125, %122 : vector<8x16xf32>
      %127 = arith.select %124, %122, %126 : vector<8x16xi1>, vector<8x16xf32>
      %cst_36 = arith.constant -1.000000e+30 : f32
      %128 = vector.broadcast %cst_36 : f32 to vector<8x16xf32>
      %129 = arith.select %5, %127, %128 : vector<8x16xi1>, vector<8x16xf32>
      %cst_37 = arith.constant dense<0xFF800000> : vector<8xf32>
      %130 = vector.multi_reduction <maximumf>, %129, %cst_37 [1] : vector<8x16xf32> to vector<8xf32>
      %131 = vector.shape_cast %130 : vector<8xf32> to vector<8x1xf32>
      %132 = vector.broadcast %131 : vector<8x1xf32> to vector<8x16xf32>
      %133 = arith.subf %129, %132 : vector<8x16xf32>
      %134 = math.exp %133 : vector<8x16xf32>
      %cst_38 = arith.constant dense<0.000000e+00> : vector<8xf32>
      %135 = vector.multi_reduction <add>, %134, %cst_38 [1] : vector<8x16xf32> to vector<8xf32>
      %136 = vector.shape_cast %135 : vector<8xf32> to vector<8x1xf32>
      %137 = tpu.reciprocal %136 {approx = true} : vector<8x1xf32> -> vector<8x1xf32>
      %138 = vector.broadcast %137 : vector<8x1xf32> to vector<8x16xf32>
      %139 = arith.mulf %134, %138 : vector<8x16xf32>
      %140 = vector.extract_strided_slice %42 {offsets = [0, 24], sizes = [16, 8], strides = [1, 1]} : vector<16x32xf32> to vector<16x8xf32>
      %141 = arith.truncf %139 : vector<8x16xf32> to vector<8x16xbf16>
      %142 = arith.truncf %140 : vector<16x8xf32> to vector<16x8xbf16>
      %cst_39 = arith.constant dense<0.000000e+00> : vector<8x8xf32>
      %143 = tpu.matmul %141, %142, %cst_39 {dimension_numbers = #tpu.dot_dimension_numbers<[1], [0], [0], [1], [0, 0, 1, 1], [], []>} : vector<8x16xbf16>, vector<16x8xbf16>, vector<8x8xf32> -> vector<8x8xf32>
      %144 = tpu.concatenate %68, %93, %118, %143 in 1 : vector<8x8xf32>, vector<8x8xf32>, vector<8x8xf32>, vector<8x8xf32> -> vector<8x32xf32>
      %c0_40 = arith.constant 0 : index
      %c0_41 = arith.constant 0 : index
      %145 = vector.load %arg6[%c0_40, %c0_41] : memref<1x32xf32, #tpu.memory_space<vmem>>, vector<1x32xf32>
      %146 = vector.broadcast %145 : vector<1x32xf32> to vector<8x32xf32>
      %147 = arith.addf %144, %146 : vector<8x32xf32>
      %cst_42 = arith.constant 0.000000e+00 : f32
      %148 = vector.broadcast %cst_42 : f32 to vector<8x32xf32>
      %149 = arith.cmpf ogt, %147, %148 : vector<8x32xf32>
      %150 = math.exp %147 : vector<8x32xf32>
      %cst_43 = arith.constant 1.000000e+00 : f32
      %151 = vector.broadcast %cst_43 : f32 to vector<8x32xf32>
      %152 = arith.subf %150, %151 : vector<8x32xf32>
      %153 = arith.select %149, %147, %152 : vector<8x32xi1>, vector<8x32xf32>
      %154 = arith.index_cast %1 : i32 to index
      %c0_44 = arith.constant 0 : index
      %155 = vector.load %arg15[%154, %c0_44] : memref<16x32xf32, #tpu.memory_space<vmem>>, vector<8x32xf32>
      tpu.vector_store %arg15[%154, %c0_44], %153 {strides = array<i32>} : memref<16x32xf32, #tpu.memory_space<vmem>>, vector<8x32xf32>,
    } else {
    }
    %c1_i32 = arith.constant 1 : i32
    %9 = arith.cmpi eq, %arg0, %c1_i32 : i32
    %10 = arith.extui %9 : i1 to i32
    %c0_i32_2 = arith.constant 0 : i32
    %11 = arith.cmpi ne, %10, %c0_i32_2 : i32
    scf.if %11 {
      %c0_i32_3 = arith.constant 0 : i32
      %12 = arith.cmpi eq, %arg1, %c0_i32_3 : i32
      %13 = arith.extui %12 : i1 to i32
      %c0_i32_4 = arith.constant 0 : i32
      %14 = arith.cmpi ne, %13, %c0_i32_4 : i32
      scf.if %14 {
        %c0_25 = arith.constant 0 : index
        %c0_26 = arith.constant 0 : index
        %62 = vector.load %arg15[%c0_25, %c0_26] : memref<16x32xf32, #tpu.memory_space<vmem>>, vector<16x32xf32>
        %63 = arith.truncf %62 : vector<16x32xf32> to vector<16x32xbf16>
        %c0_27 = arith.constant 0 : index
        %c0_28 = arith.constant 0 : index
        %64 = vector.load %arg7[%c0_27, %c0_28] : memref<32x4xf32, #tpu.memory_space<vmem>>, vector<32x4xf32>
        %65 = arith.truncf %64 : vector<32x4xf32> to vector<32x4xbf16>
        %cst_29 = arith.constant dense<0.000000e+00> : vector<16x4xf32>
        %66 = tpu.matmul %63, %65, %cst_29 {dimension_numbers = #tpu.dot_dimension_numbers<[1], [0], [0], [1], [0, 0, 1, 1], [], []>} : vector<16x32xbf16>, vector<32x4xbf16>, vector<16x4xf32> -> vector<16x4xf32>
        %c0_30 = arith.constant 0 : index
        %c0_31 = arith.constant 0 : index
        %67 = vector.load %arg16[%c0_30, %c0_31] : memref<16x4xf32, #tpu.memory_space<vmem>>, vector<16x4xf32>
        tpu.vector_store %arg16[%c0_30, %c0_31], %66 {strides = array<i32>} : memref<16x4xf32, #tpu.memory_space<vmem>>, vector<16x4xf32>,
        %c0_32 = arith.constant 0 : index
        %c0_33 = arith.constant 0 : index
        %68 = vector.load %arg8[%c0_32, %c0_33] : memref<1x4xf32, #tpu.memory_space<vmem>>, vector<1x4xf32>
        %cst_34 = arith.constant dense<0.000000e+00> : vector<1x16xf32>
        %69 = tpu.matmul %68, %66, %cst_34 {dimension_numbers = #tpu.dot_dimension_numbers<[1], [1], [0], [0], [0, 0, 1, 0], [], []>} : vector<1x4xf32>, vector<16x4xf32>, vector<1x16xf32> -> vector<1x16xf32>
        %c0_35 = arith.constant 0 : index
        %c0_36 = arith.constant 0 : index
        %70 = vector.load %arg17[%c0_35, %c0_36] : memref<1x16xf32, #tpu.memory_space<vmem>>, vector<1x16xf32>
        tpu.vector_store %arg17[%c0_35, %c0_36], %69 {strides = array<i32>} : memref<1x16xf32, #tpu.memory_space<vmem>>, vector<1x16xf32>,
      } else {
      }
      %15 = arith.index_cast %1 : i32 to index
      %c0_5 = arith.constant 0 : index
      %16 = vector.load %arg16[%15, %c0_5] : memref<16x4xf32, #tpu.memory_space<vmem>>, vector<8x4xf32>
      %c0_6 = arith.constant 0 : index
      %c0_7 = arith.constant 0 : index
      %17 = vector.load %arg9[%c0_6, %c0_7] : memref<1x4xf32, #tpu.memory_space<vmem>>, vector<1x4xf32>
      %18 = vector.broadcast %17 : vector<1x4xf32> to vector<8x4xf32>
      %19 = arith.mulf %16, %18 : vector<8x4xf32>
      %cst_8 = arith.constant dense<0.000000e+00> : vector<8xf32>
      %20 = vector.multi_reduction <add>, %19, %cst_8 [1] : vector<8x4xf32> to vector<8xf32>
      %21 = vector.shape_cast %20 : vector<8xf32> to vector<8x1xf32>
      %c0_9 = arith.constant 0 : index
      %c0_10 = arith.constant 0 : index
      %22 = vector.load %arg16[%c0_9, %c0_10] : memref<16x4xf32, #tpu.memory_space<vmem>>, vector<16x4xf32>
      %c0_11 = arith.constant 0 : index
      %c0_12 = arith.constant 0 : index
      %23 = vector.load %arg17[%c0_11, %c0_12] : memref<1x16xf32, #tpu.memory_space<vmem>>, vector<1x16xf32>
      %24 = vector.broadcast %21 : vector<8x1xf32> to vector<8x16xf32>
      %25 = vector.broadcast %23 : vector<1x16xf32> to vector<8x16xf32>
      %26 = arith.addf %24, %25 : vector<8x16xf32>
      %cst_13 = arith.constant 0.000000e+00 : f32
      %27 = vector.broadcast %cst_13 : f32 to vector<8x16xf32>
      %28 = arith.cmpf ogt, %26, %27 : vector<8x16xf32>
      %cst_14 = arith.constant 2.000000e-01 : f32
      %29 = vector.broadcast %cst_14 : f32 to vector<8x16xf32>
      %30 = arith.mulf %29, %26 : vector<8x16xf32>
      %31 = arith.select %28, %26, %30 : vector<8x16xi1>, vector<8x16xf32>
      %cst_15 = arith.constant -1.000000e+30 : f32
      %32 = vector.broadcast %cst_15 : f32 to vector<8x16xf32>
      %33 = arith.select %5, %31, %32 : vector<8x16xi1>, vector<8x16xf32>
      %cst_16 = arith.constant dense<0xFF800000> : vector<8xf32>
      %34 = vector.multi_reduction <maximumf>, %33, %cst_16 [1] : vector<8x16xf32> to vector<8xf32>
      %35 = vector.shape_cast %34 : vector<8xf32> to vector<8x1xf32>
      %36 = vector.broadcast %35 : vector<8x1xf32> to vector<8x16xf32>
      %37 = arith.subf %33, %36 : vector<8x16xf32>
      %38 = math.exp %37 : vector<8x16xf32>
      %cst_17 = arith.constant dense<0.000000e+00> : vector<8xf32>
      %39 = vector.multi_reduction <add>, %38, %cst_17 [1] : vector<8x16xf32> to vector<8xf32>
      %40 = vector.shape_cast %39 : vector<8xf32> to vector<8x1xf32>
      %41 = tpu.reciprocal %40 {approx = true} : vector<8x1xf32> -> vector<8x1xf32>
      %42 = vector.broadcast %41 : vector<8x1xf32> to vector<8x16xf32>
      %43 = arith.mulf %38, %42 : vector<8x16xf32>
      %44 = arith.truncf %43 : vector<8x16xf32> to vector<8x16xbf16>
      %45 = arith.truncf %22 : vector<16x4xf32> to vector<16x4xbf16>
      %cst_18 = arith.constant dense<0.000000e+00> : vector<8x4xf32>
      %46 = tpu.matmul %44, %45, %cst_18 {dimension_numbers = #tpu.dot_dimension_numbers<[1], [0], [0], [1], [0, 0, 1, 1], [], []>} : vector<8x16xbf16>, vector<16x4xbf16>, vector<8x4xf32> -> vector<8x4xf32>
      %c0_19 = arith.constant 0 : index
      %c0_20 = arith.constant 0 : index
      %47 = vector.load %arg10[%c0_19, %c0_20] : memref<1x4xf32, #tpu.memory_space<vmem>>, vector<1x4xf32>
      %48 = vector.broadcast %47 : vector<1x4xf32> to vector<8x4xf32>
      %49 = arith.addf %46, %48 : vector<8x4xf32>
      %cst_21 = arith.constant dense<0xFF800000> : vector<8xf32>
      %50 = vector.multi_reduction <maximumf>, %49, %cst_21 [1] : vector<8x4xf32> to vector<8xf32>
      %51 = vector.shape_cast %50 : vector<8xf32> to vector<8x1xf32>
      %52 = vector.broadcast %51 : vector<8x1xf32> to vector<8x4xf32>
      %53 = arith.subf %49, %52 : vector<8x4xf32>
      %54 = math.exp %53 : vector<8x4xf32>
      %cst_22 = arith.constant dense<0.000000e+00> : vector<8xf32>
      %55 = vector.multi_reduction <add>, %54, %cst_22 [1] : vector<8x4xf32> to vector<8xf32>
      %56 = vector.shape_cast %55 : vector<8xf32> to vector<8x1xf32>
      %57 = math.log %56 : vector<8x1xf32>
      %58 = arith.addf %51, %57 : vector<8x1xf32>
      %59 = vector.broadcast %58 : vector<8x1xf32> to vector<8x4xf32>
      %60 = arith.subf %49, %59 : vector<8x4xf32>
      %c0_23 = arith.constant 0 : index
      %c0_24 = arith.constant 0 : index
      %61 = vector.load %arg12[%c0_23, %c0_24] : memref<8x4xf32, #tpu.memory_space<vmem>>, vector<8x4xf32>
      tpu.vector_store %arg12[%c0_23, %c0_24], %60 {strides = array<i32>} : memref<8x4xf32, #tpu.memory_space<vmem>>, vector<8x4xf32>,
    } else {
    }
    return
  }
  func.func @transform_0(%arg0: i32, %arg1: i32) -> (i32, i32) {
    %c0_i32 = arith.constant 0 : i32
    %c0_i32_0 = arith.constant 0 : i32
    %c0_i32_1 = arith.constant 0 : i32
    return %c0_i32, %c0_i32_0 : i32, i32
  }
  func.func @transform_1(%arg0: i32, %arg1: i32) -> (i32, i32) {
    %c0_i32 = arith.constant 0 : i32
    %c0_i32_0 = arith.constant 0 : i32
    %c0_i32_1 = arith.constant 0 : i32
    return %c0_i32, %c0_i32_0 : i32, i32
  }
  func.func @transform_2(%arg0: i32, %arg1: i32) -> (i32, i32) {
    %c0_i32 = arith.constant 0 : i32
    %c0_i32_0 = arith.constant 0 : i32
    %c0_i32_1 = arith.constant 0 : i32
    return %c0_i32, %c0_i32_0 : i32, i32
  }
  func.func @transform_3(%arg0: i32, %arg1: i32) -> (i32, i32) {
    %c0_i32 = arith.constant 0 : i32
    %c0_i32_0 = arith.constant 0 : i32
    %c0_i32_1 = arith.constant 0 : i32
    return %c0_i32, %c0_i32_0 : i32, i32
  }
  func.func @transform_4(%arg0: i32, %arg1: i32) -> (i32, i32) {
    %c0_i32 = arith.constant 0 : i32
    %c0_i32_0 = arith.constant 0 : i32
    %c0_i32_1 = arith.constant 0 : i32
    return %c0_i32, %c0_i32_0 : i32, i32
  }
  func.func @transform_5(%arg0: i32, %arg1: i32) -> (i32, i32) {
    %c0_i32 = arith.constant 0 : i32
    %c0_i32_0 = arith.constant 0 : i32
    %c0_i32_1 = arith.constant 0 : i32
    return %c0_i32, %c0_i32_0 : i32, i32
  }
  func.func @transform_6(%arg0: i32, %arg1: i32) -> (i32, i32) {
    %c0_i32 = arith.constant 0 : i32
    %c0_i32_0 = arith.constant 0 : i32
    %c0_i32_1 = arith.constant 0 : i32
    return %c0_i32, %c0_i32_0 : i32, i32
  }
  func.func @transform_7(%arg0: i32, %arg1: i32) -> (i32, i32) {
    %c0_i32 = arith.constant 0 : i32
    %c0_i32_0 = arith.constant 0 : i32
    %c0_i32_1 = arith.constant 0 : i32
    return %c0_i32, %c0_i32_0 : i32, i32
  }
  func.func @transform_8(%arg0: i32, %arg1: i32) -> (i32, i32) {
    %c0_i32 = arith.constant 0 : i32
    %c0_i32_0 = arith.constant 0 : i32
    %c0_i32_1 = arith.constant 0 : i32
    return %c0_i32, %c0_i32_0 : i32, i32
  }
  func.func @transform_9(%arg0: i32, %arg1: i32) -> (i32, i32) {
    %c0_i32 = arith.constant 0 : i32
    %c0_i32_0 = arith.constant 0 : i32
    return %arg1, %c0_i32 : i32, i32
  }
  func.func @transform_10(%arg0: i32, %arg1: i32) -> (i32, i32) {
    %0 = arith.muli %arg0, %arg1 : i32
    %c0_i32 = arith.constant 0 : i32
    %c0_i32_0 = arith.constant 0 : i32
    return %0, %c0_i32 : i32, i32
  }
}

</mosaic_0001>

<bundles_post_ra>
// kernel: tpu_custom_call.1
= control target key start
LH: loop header
LB: loop body
LE: loop exit
PB: predicated region body
PF: predicated region fallthrough
CT: control target
= control target key end

     0   :  { %s1843_s13 = smov 0   ;;  %s1845_s14 = smov 0   ;;  %s2040_s0 = inlined_call_operand.vmem [shape: f32[16,16], index: 0, kind: input, shape index: {}]   ;;  %s2041_s1 = inlined_call_operand.vmem [shape: f32[16,32], index: 1, kind: input, shape index: {}]   ;;  %s2042_s2 = inlined_call_operand.vmem [shape: f32[4,8], index: 2, kind: input, shape index: {}]   ;;  %s2043_s3 = inlined_call_operand.vmem [shape: f32[4,8], index: 3, kind: input, shape index: {}]   ;;  %s2044_s4 = inlined_call_operand.vmem [shape: f32[1,32], index: 4, kind: input, shape index: {}]   ;;  %s2045_s5 = inlined_call_operand.vmem [shape: f32[32,4], index: 5, kind: input, shape index: {}]   ;;  %s2046_s6 = inlined_call_operand.vmem [shape: f32[1,4], index: 6, kind: input, shape index: {}]   ;;  %s2047_s7 = inlined_call_operand.vmem [shape: f32[1,4], index: 7, kind: input, shape index: {}]   ;;  %s2048_s8 = inlined_call_operand.vmem [shape: f32[1,4], index: 8, kind: input, shape index: {}]   ;;  %s2049_s9 = inlined_call_operand.vmem [shape: s8[16,16], index: 9, kind: input, shape index: {}]   ;;  %s2050_s10 = inlined_call_operand.vmem [shape: f32[16,4], index: 10, kind: output, shape index: {}]  }
   0x1   :  { %s1847_s15 = smov 0   ;;  %s1849_s16 = smov 0  }
   0x2   :  { %s1851_s17 = smov 0  }
   0x3 LB: > { %s29_s18 = sadd.s32 1, %s1759_s15  ;;  %s32_s19 = sadd.s32 1, %s1763_s16  ;;  %s1767_s17 = sphi %s1851_s17, %s20_s17   ;;  %s1763_s16 = sphi %s1849_s16, %s2056_s16   ;;  %s1759_s15 = sphi %s1847_s15, %s2055_s15   ;;  %s1755_s14 = sphi %s1845_s14, %s2054_s14   ;;  %s1751_s13 = sphi %s1843_s13, %s2053_s13  }
   0x4   : > { %p30_p0 = scmp.ge.s32.totalorder %s29_s18, 2  ;;  %p1463_p1 = scmp.ge.s32.totalorder %s1767_s17, 1 }
   0x5   : > { %p325_p2 = scmp.lt.s32.totalorder %s1767_s17, 5 }
   0x6   : > { %s2058_s18 = smov (%p30_p0, %s29_s18), 0  ;;  %s2060_s19 = smov (!%p30_p0, %s32_s19), %s1763_s16 }
   0x7   : > { %p326_p3 = pnand %p1463_p1, %p325_p2  ;;  %p34_p4 = scmp.ge.s32.totalorder %s2060_s19, 2 }
   0x8   : > { %p362_p5 = scmp.lt.s32.totalorder (!%p326_p3), %s1751_s13, 1  ;;  %s366_s20 = smul.u32 (!%p326_p3), %s1751_s13, %s1755_s14 }
   0x9   : > { %s2062_s19 = smov (%p34_p4, %s2060_s19), 0  ;;  %329 = sbr.rel (%p326_p3) target bundleno = 3113 (0xc29), region = 60 }
   0xa   : > { %s1881_s21 = sshll.u32 (!%p326_p3), %s1751_s13, 3  ;;  %p367_p6 = scmp.lt.s32.totalorder (!%p326_p3), %s366_s20, 1 }
   0xb   : > { %p1467_p7 = scmp.ne.s32.totalorder (!%p326_p3), %s1755_s14, 0 }
  0x10   : > { %s363_s22 = scalar_select %p362_p5, %s1751_s13, 1 }
  0x11   : > { %s2064_s20 = smov (!%p367_p6, %s366_s20), 1  ;;  %p1468_p8 = scmp.ne.s32.totalorder (!%p1467_p7), %s1751_s13, 0 }
  0x12   : > { %s1464_s23 = sshll.u32 %s363_s22, 1  ;;  %s1465_s27 = sshll.u32 %s2064_s20, 3 }
  0x13   : > { %s365_s26 = scalar_lea.vmem %s2049_s9, %s1464_s23  ;;  %s1890_s30 = scalar_lea.vmem %s2050_s10, %s1465_s27 }
  0x14   : > { %v374_v0 = vld [vmem:[%s365_s26] sm:$0x3]  ;;  %381 = sbr.rel (%p1467_p7) target bundleno = 1656 (0x678), region = 64 }
  0x15   : > { %v375_v1 = vunpack.c.0.s8 %v374_v0 }
  0x17   : > { %v1892_v2 = vcvt.s32.f32 %v375_v1 }
  0x19   : > { %vm377_vm0 = vcmp.gt.f32.partialorder %v1892_v2, 0.0 }
  0x1b   : > { %385 = sbr.rel (%p1468_p8) target bundleno = 596 (0x254), region = 68  ;;  %v389_v3 = vld [vmem:[%s2041_s1] sm:$0xff] (!%p1468_p8)  ;;  %v390_v4 = vld [vmem:[%s2041_s1 + $0x8] sm:$0xff] (!%p1468_p8)  ;;  %v1769_v6 = vmov (!%p1468_p8), 0.0   ;;  %vm1770_vm1 = vmmov (!%p1468_p8), 0   ;;  %vm392_vm2 = vcmask (!%p1468_p8), 130048  }
  0x1c   : > { %v386_v5 = vld [vmem:[%s2040_s0] sm:$0xff] (!%p1468_p8)  ;;  %1530 = vmatprep.subr.bf16.mxu0 (!%p1468_p8), %v1769_v6  ;;  %v391_v7 = vpack.c.bf16 (!%p1468_p8), %v390_v4, %v389_v3  ;;  %1532 = vmatprep.mubr.msk.bf16.mxu0 (!%p1468_p8), %vm1770_vm1, %v1769_v6  ;;  %v387_v8 = vld [vmem:[%s2040_s0 + $0x8] sm:$0xff] (!%p1468_p8)  ;;  %v1771_v10 = vmov (!%p1468_p8), 0.0|0.0   ;;  %vm437_vm3 = vcmask (!%p1468_p8), 261120   ;;  %vm441_vm4 = vcmask (!%p1468_p8), 64512   ;;  %s1772_s27 = smov (!%p1468_p8), 104  }
  0x1d   : > { %v388_v9 = vpack.c.bf16 (!%p1468_p8), %v387_v8, %v386_v5  ;;  %1540 = vmatprep.mubr.msk.f32.mxu1 (!%p1468_p8), %vm1770_vm1, %v1769_v6  ;;  %1609 = vmatprep.subr.bf16.mxu1 (!%p1468_p8), %v1771_v10  ;;  %vm1914_vm5 = vmpackc.low (!%p1468_p8), %vm441_vm4, %vm441_vm4  ;;  %s1773_s28 = smov (!%p1468_p8), 120   ;;  %s1774_s29 = smov (!%p1468_p8), 112   ;;  %v440_v18 = vld [vmem:[%s2042_s2] sm:$0xf] (!%p1468_p8)  ;;  %vm521_vm6 = vcmask (!%p1468_p8), 122880  }
  0x1e   : > { %1531 = vmatpush3.bf16.msra.mxu0 (!%p1468_p8), %v391_v7  ;;  %v523_v30 = vrot.slane (!%p1468_p8), %v440_v18, 1  ;;  %v605_v32 = vrot.slane (!%p1468_p8), %v440_v18, 2  ;;  %v687_v33 = vrot.slane (!%p1468_p8), %v440_v18, 3 }
  0x1f   : > { %1613 = vmatprep.subr.bf16.mxu0 (!%p1468_p8), %v1771_v10 }
  0x21   : > { %1533 = vmatmul.mubr.msk.bf16.vlgmr.msra.gmra.mrb[0].mxu0 (!%p1468_p8), %vm392_vm2, %v388_v9 }
  0x22   : > { %1547 = vmatprep.mubr.msk.f32.mxu0 %vm1770_vm1, %v1769_v6 }
  0xf4   : > { %v430_v11 = vpop.f32.mrb[0].mxu0 }
  0xf5   : > { %438 = vst.msk [vmem:[#allocation2] sm:$0xff] %vm437_vm3, %v430_v11  ;;  %v1534_v12 = vpop.f32.mrb[1].mxu0 }
  0xf6   : > { %v433_v13 = vpop.f32.mrb[2].mxu0 }
  0xf7   : > { %439 = vst.msk [vmem:[#allocation2 + $0x8] sm:$0xff] %vm437_vm3, %v433_v13  ;;  %v1535_v14 = vpop.f32.mrb[3].mxu0  ;;  %v1698_v15 = vpack.i.bf16 %v433_v13, %v430_v11  ;;  %v1610_v16 = vpack.c.bf16 %v433_v13, %v430_v11 }
  0xf9   : > { %1699 = vrot.lane.b32.xlu1 %v1698_v15, %s1772_s27  ;;  %1689 = vrot.lane.b32.xlu0 %v1698_v15, %s1773_s28 }
  0xfa   : > { %1612 = vmatpush3.bf16.xpose.msk.msra.mxu1 %vm1914_vm5, %v1610_v16 }
  0xfb   : > { %1617 = vmatprep.subr.bf16.mxu1 %v1771_v10 }
  0xfd   : > { %1694 = vrot.lane.b32.xlu0 %v1698_v15, %s1774_s29 }
 0x101   : > { %1541 = vmatmul.mubr.msk.f32.vlgmr.msra.gmra.mrb[0].mxu1 %vm441_vm4, %v440_v18 }
 0x102   : > { %1554 = vmatprep.mubr.msk.f32.mxu1 %vm1770_vm1, %v1769_v6 }
 0x16b   : > { %v1690_v19 = vpop.permute.xlu0 %1689  ;;  %v1700_v23 = vpop.permute.xlu1 %1699 }
 0x16c   : > { %v1692_v20 = vunpack.i.h.bf16 %v1690_v19  ;;  %v1691_v21 = vunpack.i.l.bf16 %v1690_v19  ;;  %v1702_v27 = vunpack.i.h.bf16 %v1700_v23  ;;  %v1701_v28 = vunpack.i.l.bf16 %v1700_v23 }
 0x16e   : > { %v1614_v22 = vpack.c.bf16 %v1692_v20, %v1691_v21  ;;  %v1622_v31 = vpack.c.bf16 %v1702_v27, %v1701_v28 }
 0x16f   : > { %v1695_v24 = vpop.permute.xlu0 %1694 }
 0x170   : > { %v1697_v25 = vunpack.i.h.bf16 %v1695_v24  ;;  %v1696_v26 = vunpack.i.l.bf16 %v1695_v24  ;;  %1616 = vmatpush3.bf16.xpose.msk.msra.mxu0 %vm1914_vm5, %v1614_v22 }
 0x171   : > { %1621 = vmatprep.subr.bf16.mxu0 %v1771_v10 }
 0x172   : > { %v1618_v29 = vpack.c.bf16 %v1697_v25, %v1696_v26 }
 0x174   : > { %1620 = vmatpush3.bf16.xpose.msk.msra.mxu1 %vm1914_vm5, %v1618_v29 }
 0x177   : > { %1548 = vmatmul.mubr.msk.f32.vlgmr.msra.gmra.mrb[4].mxu0 %vm441_vm4, %v523_v30 }
 0x178   : > { %1624 = vmatpush3.bf16.xpose.msk.msra.mxu0 %vm1914_vm5, %v1622_v31  ;;  %1561 = vmatprep.mubr.msk.f32.mxu0 %vm1770_vm1, %v1769_v6 }
 0x17b   : > { %1555 = vmatmul.mubr.msk.f32.vlgmr.msra.gmra.mrb[2].mxu1 %vm441_vm4, %v605_v32 }
 0x17f   : > { %1562 = vmatmul.mubr.msk.f32.vlgmr.msra.gmra.mrb[6].mxu0 %vm441_vm4, %v687_v33 }
 0x1d4   : > { %v517_v34 = vpop.f32.mrb[0].mxu1 }
 0x1d5   : > { %522 = vst.msk [vmem:[#allocation3] sm:$0x1] %vm521_vm6, %v517_v34  ;;  %v1542_v35 = vpop.f32.mrb[1].mxu1 }
 0x24a   : > { %v600_v36 = vpop.f32.mrb[4].mxu0 }
 0x24b   : > { %604 = vst.msk [vmem:[#allocation3 + $0x1] sm:$0x1] %vm521_vm6, %v600_v36  ;;  %v1549_v37 = vpop.f32.mrb[5].mxu0 }
 0x24e   : > { %v682_v38 = vpop.f32.mrb[2].mxu1 }
 0x24f   : > { %686 = vst.msk [vmem:[#allocation3 + $0x2] sm:$0x1] %vm521_vm6, %v682_v38  ;;  %v1556_v39 = vpop.f32.mrb[3].mxu1 }
 0x252   : > { %v764_v40 = vpop.f32.mrb[6].mxu0 }
 0x253   : > { %768 = vst.msk [vmem:[#allocation3 + $0x3] sm:$0x1] %vm521_vm6, %v764_v40  ;;  %v1563_v41 = vpop.f32.mrb[7].mxu0 }
 0x254 PF: > { %v772_v42 = vlaneseq  ;;  %v771_v44 = vld [vmem:[%s2043_s3] sm:$0xf]  ;;  %s1775_s23 = smov 8   ;;  %s1776_s24 = smov 24   ;;  %vm777_vm7 = vcmask 64512   ;;  %vm841_vm9 = vcmask 130048  }
 0x255   : > { %s1777_s25 = smov 16   ;;  %s769_s26 = scalar_lea.vmem [#allocation2], %s1881_s21  ;;  %v829_v39 = vld [vmem:[#allocation2] sm:$0xff]  ;;  %v830_v40 = vld [vmem:[#allocation2 + $0x8] sm:$0xff]  ;;  %vm1782_vm13 = vmmov 0   ;;  %vm1114_vm14 = vcmask 195584  }
 0x256   : > { %v1935_v43 = vshrl.u32 %v772_v42, 7  ;;  %v770_v51 = vld [vmem:[%s769_s26] sm:$0xff]  ;;  %s1778_s27 = smov 120   ;;  %s1779_s28 = smov 112   ;;  %v854_v41 = vpack.c.bf16 %v830_v40, %v829_v39  ;;  %v1781_v42 = vmov 0.0   ;;  %vm1130_vm15 = vcmask 261120  }
 0x257   : > { %s1780_s29 = smov 104   ;;  %1564 = vmatprep.subr.bf16.mxu0 %v1781_v42  ;;  %1566 = vmatprep.mubr.msk.bf16.mxu0 %vm1782_vm13, %v1781_v42  ;;  %s1129_s20 = scalar_lea.vmem [#allocation4], %s1881_s21 }
 0x258   : > { %v783_v45 = vsub.s32 1, %v1935_v43  ;;  %v799_v46 = vsub.s32 2, %v1935_v43  ;;  %v815_v47 = vsub.s32 3, %v1935_v43  ;;  %v774_v58 = vsub.s32 0, %v1935_v43  ;;  %1565 = vmatpush3.bf16.msra.mxu0 %v854_v41  ;;  %1570 = vmatprep.subr.bf16.mxu1 %v1781_v42 }
 0x259   : > { %1576 = vmatprep.subr.bf16.mxu0 %v1781_v42  ;;  %1572 = vmatprep.mubr.msk.bf16.mxu1 %vm1782_vm13, %v1781_v42 }
 0x25a   : > { %v784_v48 = vrot.slane %v771_v44, %v783_v45  ;;  %v816_v49 = vrot.slane %v771_v44, %v815_v47  ;;  %v800_v50 = vrot.slane %v771_v44, %v799_v46  ;;  %v775_v59 = vrot.slane %v771_v44, %v774_v58  ;;  %v831_v5 = vld [vmem:[#allocation3] sm:$0xf] }
 0x25b   : > { %v835_v6 = vrot.slane %v831_v5, %v774_v58  ;;  %v901_v13 = vrot.slane %v831_v5, %v783_v45  ;;  %v969_v16 = vrot.slane %v831_v5, %v799_v46  ;;  %v1036_v21 = vrot.slane %v831_v5, %v815_v47 }
 0x25c   : > { %786 = vrot.lane.b32.xlu0 %v784_v48, %s1775_s23  ;;  %818 = vrot.lane.b32.xlu1 %v816_v49, %s1776_s24  ;;  %v776_v60 = vmul.f32 %v775_v59, %v770_v51 }
 0x25e   : > { %v778_v61 = vsel %vm777_vm7, %v776_v60, 0.0 }
 0x260   : > { %802 = vrot.lane.b32.xlu0 %v800_v50, %s1777_s25 }
 0x2ce   : > { %v787_v52 = vpop.permute.xlu0 %786  ;;  %v819_v53 = vpop.permute.xlu1 %818 }
 0x2cf   : > { %v789_v54 = vmul.f32 %v787_v52, %v770_v51  ;;  %v821_v55 = vmul.f32 %v819_v53, %v770_v51 }
 0x2d1   : > { %791 = vrot.lane.b32.xlu1 %v789_v54, %s1778_s27 }
 0x2d2   : > { %v803_v56 = vpop.permute.xlu0 %802 }
 0x2d3   : > { %v805_v57 = vmul.f32 %v803_v56, %v770_v51 }
 0x2d5   : > { %807 = vrot.lane.b32.xlu0 %v805_v57, %s1779_s28  ;;  %823 = vrot.lane.b32.xlu1 %v821_v55, %s1780_s29 }
 0x2f4   : > { %779 = vadd.xlane.f32.xlu0 %v778_v61 }
 0x343   : > { %v792_v62 = vpop.permute.xlu1 %791 }
 0x344   : > { %v794_v63 = vsel %vm777_vm7, %v792_v62, 0.0 }
 0x345   : > { %795 = vadd.xlane.f32.xlu1 %v794_v63 }
 0x347   : > { %v808_v0 = vpop.permute.xlu0 %807  ;;  %v824_v1 = vpop.permute.xlu1 %823 }
 0x348   : > { %v810_v3 = vsel %vm777_vm7, %v808_v0, 0.0  ;;  %v826_v4 = vsel %vm777_vm7, %v824_v1, 0.0 }
 0x349   : > { %811 = vadd.xlane.f32.xlu0 %v810_v3 }
 0x34d   : > { %827 = vadd.xlane.f32.xlu0 %v826_v4 }
 0x381   : > { %v780_v7 = vpop.xlane.xlu0 %779 }
 0x382   : > { %v836_v8 = vadd.f32 %v835_v6, %v780_v7 }
 0x384   : > { %v838_v9 = vmul.f32 0.2, %v836_v8  ;;  %vm837_vm8 = vcmp.gt.f32.partialorder %v836_v8, 0.0 }
 0x386   : > { %v839_v10 = vsel %vm837_vm8, %v836_v8, %v838_v9 }
 0x387   : > { %v840_v11 = vsel %vm377_vm0, %v839_v10, -1e+30 }
 0x388   : > { %v842_v12 = vsel %vm841_vm9, %v840_v11, -inf }
 0x389   : > { %843 = vmax.xlane.f32.xlu1 %v842_v12 }
 0x3d2   : > { %v796_v14 = vpop.xlane.xlu1 %795 }
 0x3d3   : > { %v902_v15 = vadd.f32 %v901_v13, %v796_v14 }
 0x3d5   : > { %v904_v17 = vmul.f32 0.2, %v902_v15  ;;  %vm903_vm10 = vcmp.gt.f32.partialorder %v902_v15, 0.0 }
 0x3d6   : > { %v812_v18 = vpop.xlane.xlu0 %811 }
 0x3d7   : > { %v970_v19 = vadd.f32 %v969_v16, %v812_v18  ;;  %v905_v20 = vsel %vm903_vm10, %v902_v15, %v904_v17 }
 0x3d8   : > { %v906_v22 = vsel %vm377_vm0, %v905_v20, -1e+30 }
 0x3d9   : > { %v972_v23 = vmul.f32 0.2, %v970_v19  ;;  %v907_v24 = vsel %vm841_vm9, %v906_v22, -inf  ;;  %vm971_vm11 = vcmp.gt.f32.partialorder %v970_v19, 0.0 }
 0x3da   : > { %908 = vmax.xlane.f32.xlu0 %v907_v24  ;;  %v828_v25 = vpop.xlane.xlu0 %827 }
 0x3db   : > { %v1037_v26 = vadd.f32 %v1036_v21, %v828_v25  ;;  %v973_v27 = vsel %vm971_vm11, %v970_v19, %v972_v23 }
 0x3dc   : > { %v974_v28 = vsel %vm377_vm0, %v973_v27, -1e+30 }
 0x3dd   : > { %v1039_v29 = vmul.f32 0.2, %v1037_v26  ;;  %v975_v30 = vsel %vm841_vm9, %v974_v28, -inf  ;;  %vm1038_vm12 = vcmp.gt.f32.partialorder %v1037_v26, 0.0 }
 0x3de   : > { %976 = vmax.xlane.f32.xlu1 %v975_v30 }
 0x3df   : > { %v1040_v31 = vsel %vm1038_vm12, %v1037_v26, %v1039_v29 }
 0x3e0   : > { %v1041_v32 = vsel %vm377_vm0, %v1040_v31, -1e+30 }
 0x3e1   : > { %v1042_v33 = vsel %vm841_vm9, %v1041_v32, -inf }
 0x3e2   : > { %1043 = vmax.xlane.f32.xlu0 %v1042_v33  ;;  %v1486_v33 = vld [vmem:[%s2044_s4] ss:$0 sm:$0xff] }
 0x416   : > { %v844_v34 = vpop.xlane.xlu1 %843 }
 0x417   : > { %v845_v35 = vsub.f32 %v840_v11, %v844_v34 }
 0x419   : > { %v846_v36 = vmul.f32 1.442695, %v845_v35 }
 0x41b   : > { %1703 = vpow2.f32 %v846_v36 }
 0x425   : > { %v1704_v37 = vpop.eup %1703 }
 0x426   : > { %v848_v38 = vsel %vm841_vm9, %v1704_v37, 0.0 }
 0x427   : > { %849 = vadd.xlane.f32.xlu1 %v848_v38 }
 0x438   : > { %920 = vrot.lane.b32.xlu1 %v854_v41, %s1778_s27 }
 0x467   : > { %v909_v43 = vpop.xlane.xlu0 %908 }
 0x468   : > { %v910_v44 = vsub.f32 %v906_v22, %v909_v43 }
 0x46a   : > { %v911_v45 = vmul.f32 1.442695, %v910_v44 }
 0x46b   : > { %v977_v46 = vpop.xlane.xlu1 %976 }
 0x46c   : > { %1705 = vpow2.f32 %v911_v45  ;;  %v978_v47 = vsub.f32 %v974_v28, %v977_v46 }
 0x46e   : > { %v979_v48 = vmul.f32 1.442695, %v978_v47 }
 0x46f   : > { %v1044_v49 = vpop.xlane.xlu0 %1043 }
 0x470   : > { %1707 = vpow2.f32 %v979_v48  ;;  %v1045_v50 = vsub.f32 %v1041_v32, %v1044_v49 }
 0x472   : > { %v1046_v51 = vmul.f32 1.442695, %v1045_v50 }
 0x474   : > { %1709 = vpow2.f32 %v1046_v51 }
 0x476   : > { %v1706_v52 = vpop.eup %1705 }
 0x477   : > { %v913_v53 = vsel %vm841_vm9, %v1706_v52, 0.0 }
 0x478   : > { %914 = vadd.xlane.f32.xlu0 %v913_v53 }
 0x47a   : > { %v1708_v54 = vpop.eup %1707 }
 0x47b   : > { %v981_v55 = vsel %vm841_vm9, %v1708_v54, 0.0 }
 0x47c   : > { %982 = vadd.xlane.f32.xlu1 %v981_v55 }
 0x47e   : > { %v1710_v56 = vpop.eup %1709 }
 0x47f   : > { %v1048_v57 = vsel %vm841_vm9, %v1710_v56, 0.0 }
 0x480   : > { %1049 = vadd.xlane.f32.xlu0 %v1048_v57 }
 0x48d   : > { %1054 = vrot.lane.b32.xlu1 %v854_v41, %s1780_s29 }
 0x496   : > { %987 = vrot.lane.b32.xlu0 %v854_v41, %s1779_s28 }
 0x4b4   : > { %v850_v58 = vpop.xlane.xlu1 %849 }
 0x4b5   : > { %1711 = vrcp.f32 %v850_v58 }
 0x4b8   : > { %v921_v59 = vpop.permute.xlu1 %920 }
 0x4b9   : > { %1571 = vmatpush3.bf16.msra.mxu1 %v921_v59 }
 0x4ba   : > { %1582 = vmatprep.subr.bf16.mxu1 %v1781_v42 }
 0x4bf   : > { %v1712_v60 = vpop.eup %1711 }
 0x4c0   : > { %v852_v61 = vmul.f32 %v1712_v60, %v1704_v37 }
 0x4c2   : > { %v853_v62 = vpack.c.bf16 %v852_v61, %v852_v61 }
 0x4c4   : > { %1567 = vmatmul.mubr.msk.bf16.vlgmr.msra.gmra.mrb[0].mxu0 %vm841_vm9, %v853_v62 }
 0x4c5   : > { %1578 = vmatprep.mubr.msk.bf16.mxu0 %vm1782_vm13, %v1781_v42 }
 0x505   : > { %v915_v63 = vpop.xlane.xlu0 %914 }
 0x506   : > { %1713 = vrcp.f32 %v915_v63 }
 0x509   : > { %v983_v0 = vpop.xlane.xlu1 %982 }
 0x50a   : > { %1715 = vrcp.f32 %v983_v0 }
 0x50d   : > { %v1050_v1 = vpop.xlane.xlu0 %1049  ;;  %v1055_v6 = vpop.permute.xlu1 %1054 }
 0x50e   : > { %1717 = vrcp.f32 %v1050_v1 }
 0x510   : > { %v1714_v3 = vpop.eup %1713 }
 0x511   : > { %v988_v4 = vpop.permute.xlu0 %987  ;;  %v917_v5 = vmul.f32 %v1714_v3, %v1706_v52 }
 0x512   : > { %1577 = vmatpush3.bf16.msra.mxu0 %v988_v4 }
 0x513   : > { %v918_v7 = vpack.c.bf16 %v917_v5, %v917_v5 }
 0x514   : > { %v1716_v8 = vpop.eup %1715 }
 0x515   : > { %v985_v9 = vmul.f32 %v1716_v8, %v1708_v54  ;;  %1573 = vmatmul.mubr.msk.bf16.vlgmr.msra.gmra.mrb[0].mxu1 %vm841_vm9, %v918_v7 }
 0x516   : > { %1583 = vmatpush3.bf16.msra.mxu1 %v1055_v6  ;;  %1584 = vmatprep.mubr.msk.bf16.mxu1 %vm1782_vm13, %v1781_v42 }
 0x517   : > { %v986_v10 = vpack.c.bf16 %v985_v9, %v985_v9 }
 0x518   : > { %v1718_v11 = vpop.eup %1717 }
 0x519   : > { %v1052_v12 = vmul.f32 %v1718_v11, %v1710_v56  ;;  %1579 = vmatmul.mubr.msk.bf16.vlgmr.msra.gmra.mrb[4].mxu0 %vm841_vm9, %v986_v10 }
 0x51b   : > { %v1053_v13 = vpack.c.bf16 %v1052_v12, %v1052_v12 }
 0x51d   : > { %1585 = vmatmul.mubr.msk.bf16.vlgmr.msra.gmra.mrb[4].mxu1 %vm841_vm9, %v1053_v13 }
 0x597   : > { %v892_v14 = vpop.f32.mrb[0].mxu0 }
 0x598   : > { %v1568_v15 = vpop.f32.mrb[1].mxu0 }
 0x599   : > { %v895_v16 = vpop.f32.mrb[2].mxu0 }
 0x59a   : > { %v1569_v17 = vpop.f32.mrb[3].mxu0 }
 0x5e8   : > { %v960_v18 = vpop.f32.mrb[0].mxu1 }
 0x5e9   : > { %1101 = vrot.lane.b32.xlu1 %v960_v18, %s1775_s23  ;;  %v1574_v19 = vpop.f32.mrb[1].mxu1 }
 0x5ea   : > { %v963_v20 = vpop.f32.mrb[2].mxu1 }
 0x5eb   : > { %v1575_v21 = vpop.f32.mrb[3].mxu1 }
 0x5ec   : > { %v1027_v22 = vpop.f32.mrb[4].mxu0 }
 0x5ed   : > { %1105 = vrot.lane.b32.xlu0 %v1027_v22, %s1777_s25  ;;  %v1580_v23 = vpop.f32.mrb[5].mxu0 }
 0x5ee   : > { %v1030_v24 = vpop.f32.mrb[6].mxu0 }
 0x5ef   : > { %v1581_v25 = vpop.f32.mrb[7].mxu0 }
 0x5f0   : > { %v1094_v26 = vpop.f32.mrb[4].mxu1 }
 0x5f1   : > { %1109 = vrot.lane.b32.xlu1 %v1094_v26, %s1776_s24  ;;  %v1586_v27 = vpop.f32.mrb[5].mxu1 }
 0x5f2   : > { %v1097_v28 = vpop.f32.mrb[6].mxu1 }
 0x5f3   : > { %v1587_v29 = vpop.f32.mrb[7].mxu1 }
 0x65b   : > { %v1102_v30 = vpop.permute.xlu1 %1101 }
 0x65c   : > { %v1112_v32 = vsel %vm777_vm7, %v892_v14, %v1102_v30 }
 0x65f   : > { %v1106_v31 = vpop.permute.xlu0 %1105 }
 0x660   : > { %v1113_v34 = vsel %vm841_vm9, %v1112_v32, %v1106_v31 }
 0x663   : > { %v1110_v35 = vpop.permute.xlu1 %1109 }
 0x664   : > { %v1115_v36 = vsel %vm1114_vm14, %v1113_v34, %v1110_v35 }
 0x665   : > { %v1123_v37 = vadd.f32 %v1486_v33, %v1115_v36 }
 0x667   : > { %v1125_v38 = vmul.f32 1.442695, %v1123_v37  ;;  %vm1124_vm1 = vcmp.gt.f32.partialorder %v1123_v37, 0.0 }
 0x669   : > { %1719 = vpow2.f32 %v1125_v38 }
 0x673   : > { %v1720_v39 = vpop.eup %1719 }
 0x674   : > { %v1487_v40 = vadd.f32 -1.0, %v1720_v39 }
 0x676   : > { %v1128_v41 = vsel %vm1124_vm1, %v1123_v37, %v1487_v40 }
 0x677   : > { %1131 = vst.msk [vmem:[%s1129_s20] sm:$0xff] %vm1130_vm15, %v1128_v41 }
 0x678 PF: > { %p1488_p9 = scmp.ne.s32.totalorder %s1755_s14, 1 }
 0x679   : > { %p1489_p10 = scmp.ne.s32.totalorder (!%p1488_p9), %s1751_s13, 0 }
 0x67a   : > { %1135 = sbr.rel (%p1488_p9) target bundleno = 3113 (0xc29), region = 72 }
 0x681   : > { %1139 = sbr.rel (%p1489_p10) target bundleno = 2111 (0x83f), region = 76  ;;  %v1143_v42 = vld [vmem:[%s2045_s5] sm:$0xff] (!%p1489_p10)  ;;  %v1144_v43 = vld [vmem:[%s2045_s5 + $0x8] sm:$0xff] (!%p1489_p10)  ;;  %v1145_v44 = vld [vmem:[%s2045_s5 + $0x10] sm:$0xff] (!%p1489_p10)  ;;  %v1783_v45 = vmov (!%p1489_p10), 0.0   ;;  %vm1784_vm2 = vmmov (!%p1489_p10), 0  }
 0x682   : > { %1588 = vmatprep.subr.bf16.mxu0 (!%p1489_p10), %v1783_v45  ;;  %v1147_v46 = vpack.c.bf16 (!%p1489_p10), %v1144_v43, %v1143_v42  ;;  %v1146_v47 = vld [vmem:[%s2045_s5 + $0x18] sm:$0xff] (!%p1489_p10)  ;;  %1592 = vmatprep.mubr.msk.bf16.mxu0 (!%p1489_p10), %vm1784_vm2, %v1783_v45  ;;  %vm1149_vm3 = vcmask (!%p1489_p10), 261120   ;;  %v1785_v52 = vmov (!%p1489_p10), 0.0|0.0   ;;  %vm1194_vm4 = vcmask (!%p1489_p10), 31744   ;;  %v1197_v58 = vld [vmem:[%s2046_s6] sm:$0x1] (!%p1489_p10) }
 0x683   : > { %1600 = vmatprep.mubr.msk.f32.mxu1 (!%p1489_p10), %vm1784_vm2, %v1783_v45  ;;  %v1148_v48 = vpack.c.bf16 (!%p1489_p10), %v1146_v47, %v1145_v44  ;;  %v1140_v49 = vld [vmem:[#allocation4] sm:$0xff] (!%p1489_p10)  ;;  %v1141_v50 = vld [vmem:[#allocation4 + $0x8] sm:$0xff] (!%p1489_p10)  ;;  %1625 = vmatprep.subr.bf16.mxu1 (!%p1489_p10), %v1785_v52  ;;  %vm1627_vm5 = vmpackc.low (!%p1489_p10), %vm1194_vm4, %vm1194_vm4  ;;  %vm1277_vm6 = vcmask (!%p1489_p10), 122880  }
 0x684   : > { %1589 = vmatpush3.bf16.msra.mxu0 (!%p1489_p10), %v1147_v46  ;;  %v1142_v51 = vpack.c.bf16 (!%p1489_p10), %v1141_v50, %v1140_v49 }
 0x685   : > { %1590 = vmatprep.subr.bf16.mxu0 (!%p1489_p10), %v1783_v45 }
 0x688   : > { %1591 = vmatpush3.bf16.msra.mxu0 %v1148_v48 }
 0x68b   : > { %1593 = vmatmul.mubr.msk.bf16.vlgmr.msra.gmra.mrb[0].mxu0 %vm1149_vm3, %v1142_v51 }
 0x75e   : > { %v1187_v53 = vpop.f32.mrb[0].mxu0 }
 0x75f   : > { %1195 = vst.msk [vmem:[#allocation5] sm:$0xff] %vm1194_vm4, %v1187_v53  ;;  %v1594_v54 = vpop.f32.mrb[1].mxu0 }
 0x760   : > { %v1190_v55 = vpop.f32.mrb[2].mxu0 }
 0x761   : > { %1196 = vst.msk [vmem:[#allocation5 + $0x8] sm:$0xff] %vm1194_vm4, %v1190_v55  ;;  %v1626_v56 = vpack.c.bf16 %v1190_v55, %v1187_v53  ;;  %v1595_v57 = vpop.f32.mrb[3].mxu0 }
 0x763   : > { %1628 = vmatpush3.bf16.xpose.msk.msra.mxu1 %vm1627_vm5, %v1626_v56 }
 0x76a   : > { %1601 = vmatmul.mubr.msk.f32.vlgmr.msra.gmra.mrb[0].mxu1 %vm1194_vm4, %v1197_v58 }
 0x83d   : > { %v1273_v59 = vpop.f32.mrb[0].mxu1 }
 0x83e   : > { %1278 = vst.msk [vmem:[#allocation6] sm:$0x1] %vm1277_vm6, %v1273_v59  ;;  %v1602_v60 = vpop.f32.mrb[1].mxu1 }
 0x83f PF: > { %v1494_v61 = vld [vmem:[%s2047_s7] ss:$0 sm:$0xff]  ;;  %s1279_s20 = scalar_lea.vmem [#allocation5], %s1881_s21  ;;  %vm1289_vm7 = vcmask 31744   ;;  %vm1307_vm9 = vcmask 130048   ;;  %v1293_v14 = vld [vmem:[#allocation5] sm:$0xff] }
 0x840   : > { %v1280_v62 = vld [vmem:[%s1279_s20] sm:$0xff]  ;;  %v1294_v15 = vld [vmem:[#allocation5 + $0x8] sm:$0xff]  ;;  %v1786_v16 = vmov 0.0   ;;  %vm1787_vm10 = vmmov 0  }
 0x841   : > { %v1288_v63 = vmul.f32 %v1494_v61, %v1280_v62  ;;  %1603 = vmatprep.subr.bf16.mxu0 %v1786_v16  ;;  %v1320_v17 = vpack.c.bf16 %v1294_v15, %v1293_v14  ;;  %1605 = vmatprep.mubr.msk.bf16.mxu0 %vm1787_vm10, %v1786_v16  ;;  %v1496_v21 = vld [vmem:[%s2048_s8] ss:$0 sm:$0xff] }
 0x843   : > { %v1290_v0 = vsel %vm1289_vm7, %v1288_v63, 0.0  ;;  %1604 = vmatpush3.bf16.msra.mxu0 %v1320_v17 }
 0x844   : > { %1291 = vadd.xlane.f32.xlu0 %v1290_v0 }
 0x845   : > { %v1495_v1 = vld [vmem:[#allocation6] ss:$0 sm:$0xff] }
 0x8d1   : > { %v1292_v3 = vpop.xlane.xlu0 %1291 }
 0x8d2   : > { %v1302_v4 = vadd.f32 %v1495_v1, %v1292_v3 }
 0x8d4   : > { %v1304_v5 = vmul.f32 0.2, %v1302_v4  ;;  %vm1303_vm8 = vcmp.gt.f32.partialorder %v1302_v4, 0.0 }
 0x8d6   : > { %v1305_v6 = vsel %vm1303_vm8, %v1302_v4, %v1304_v5 }
 0x8d7   : > { %v1306_v7 = vsel %vm377_vm0, %v1305_v6, -1e+30 }
 0x8d8   : > { %v1308_v8 = vsel %vm1307_vm9, %v1306_v7, -inf }
 0x8d9   : > { %1309 = vmax.xlane.f32.xlu0 %v1308_v8 }
 0x966   : > { %v1310_v9 = vpop.xlane.xlu0 %1309 }
 0x967   : > { %v1311_v10 = vsub.f32 %v1306_v7, %v1310_v9 }
 0x969   : > { %v1312_v11 = vmul.f32 1.442695, %v1311_v10 }
 0x96b   : > { %1721 = vpow2.f32 %v1312_v11 }
 0x975   : > { %v1722_v12 = vpop.eup %1721 }
 0x976   : > { %v1314_v13 = vsel %vm1307_vm9, %v1722_v12, 0.0 }
 0x977   : > { %1315 = vadd.xlane.f32.xlu1 %v1314_v13 }
 0xa04   : > { %v1316_v2 = vpop.xlane.xlu1 %1315 }
 0xa05   : > { %1723 = vrcp.f32 %v1316_v2 }
 0xa0f   : > { %v1724_v18 = vpop.eup %1723 }
 0xa10   : > { %v1318_v19 = vmul.f32 %v1724_v18, %v1722_v12 }
 0xa12   : > { %v1319_v20 = vpack.c.bf16 %v1318_v19, %v1318_v19 }
 0xa14   : > { %1606 = vmatmul.mubr.msk.bf16.vlgmr.msra.gmra.mrb[0].mxu0 %vm1307_vm9, %v1319_v20 }
 0xae7   : > { %v1365_v22 = vpop.f32.mrb[0].mxu0 }
 0xae8   : > { %v1366_v23 = vadd.f32 %v1496_v21, %v1365_v22  ;;  %v1607_v24 = vpop.f32.mrb[1].mxu0 }
 0xae9   : > { %v1368_v25 = vpop.f32.mrb[2].mxu0 }
 0xaea   : > { %v1608_v26 = vpop.f32.mrb[3].mxu0  ;;  %v1371_v27 = vsel %vm1289_vm7, %v1366_v23, -inf }
 0xaeb   : > { %1372 = vmax.xlane.f32.xlu1 %v1371_v27 }
 0xb78   : > { %v1373_v28 = vpop.xlane.xlu1 %1372 }
 0xb79   : > { %v1374_v29 = vsub.f32 %v1366_v23, %v1373_v28 }
 0xb7b   : > { %v1375_v30 = vmul.f32 1.442695, %v1374_v29 }
 0xb7d   : > { %1725 = vpow2.f32 %v1375_v30 }
 0xb87   : > { %v1726_v31 = vpop.eup %1725 }
 0xb88   : > { %v1377_v32 = vsel %vm1289_vm7, %v1726_v31, 0.0 }
 0xb89   : > { %1378 = vadd.xlane.f32.xlu0 %v1377_v32 }
 0xc16   : > { %v1379_v33 = vpop.xlane.xlu0 %1378 }
 0xc17   : > { %1727 = vlog2.f32 %v1379_v33 }
 0xc21   : > { %v1728_v34 = vpop.eup %1727 }
 0xc22   : > { %v1381_v35 = vmul.f32 0.6931472, %v1728_v34 }
 0xc24   : > { %v1382_v36 = vadd.f32 %v1381_v35, %v1373_v28 }
 0xc26   : > { %v1383_v37 = vsub.f32 %v1366_v23, %v1382_v36 }
 0xc28   : > { %1384 = vst.msk [vmem:[%s1890_s30] sm:$0xff] %vm1289_vm7, %v1383_v37 }
 0xc29 PF: > { %s20_s17 = sadd.s32 1, %s1767_s17   ;;  %s2053_s13 = smov %s1759_s15 }
 0xc2a   : > { %p17_p11 = scmp.ge.s32.totalorder %s20_s17, 6   ;;  %s2054_s14 = smov %s1763_s16 }
 0xc2b   : > { %s2055_s15 = smov %s2058_s18  ;;  %s2056_s16 = smov %s2062_s19 }
 0xc2c   :  { %19 = sbr.rel (!%p17_p11) target bundleno = 3 (0x3), region = 109 }

</bundles_post_ra>
